<compile_context>
chip_gen: v5e
topology: v5e:2x2
jax: 0.10.0
libtpu: 0.0.40
codegen_flags: <defaults>
</compile_context>

<pallas_src>
import functools

import jax
import jax.numpy as jnp
from jax.experimental import pallas as pl
from jax.experimental.pallas import tpu as pltpu

CONTEXT_FEATURES = 16
BEHAVIORAL_VECTOR_DIM = 32          # CONFIG.BEHAVIORAL_VECTOR_DIM (synthetic choice)
ADAPTER_IN = CONTEXT_FEATURES + BEHAVIORAL_VECTOR_DIM + 1   # 49
NUM_CLASSES = 4

PAD_W = 32                          # every hidden width zero-padded to 32 lanes
TB_DEFAULT = 2048                   # rows per grid step (capped for v7x VMEM)

# Row offsets inside the packed bf16 weight slab (all 16-row aligned).
_W1_R, _W2_R, _W3E_R, _W3B_R, _W3A_R, _W4_R, _W5_R = 0, 16, 48, 80, 112, 128, 160
_WSLAB_ROWS = 192
_BSLAB_ROWS = 8


def _round_up(x, m):
    return ((x + m - 1) // m) * m


def _context_adapter_kernel(ctx_ref, beh_ref, anom_ref, w_ref, b_ref, out_ref):
    f32, bf16 = jnp.float32, jnp.bfloat16

    # Lane-0-aligned input streams; cast to bf16 for the MXU inside the kernel.
    ctx = ctx_ref[...].astype(bf16)                    # (TB, 16)
    beh = beh_ref[...].astype(bf16)                    # (TB, 32)
    anom = anom_ref[...]                               # (TB, 1) f32

    # VMEM-resident parameter slabs (constant index_map -> fetched once).
    w1 = w_ref[_W1_R:_W1_R + 16, :]                    # (16, 32)
    w2 = w_ref[_W2_R:_W2_R + 32, :]                    # (32, 32)  out cols 16:32 = 0
    w3e = w_ref[_W3E_R:_W3E_R + 32, :]                 # (32, 32)  in rows 16:32 = 0
    w3b = w_ref[_W3B_R:_W3B_R + 32, :]                 # (32, 32)
    w3a = w_ref[_W3A_R:_W3A_R + 1, :].astype(f32)      # (1, 32)   anomaly row
    w4 = w_ref[_W4_R:_W4_R + 32, :]                    # (32, 32)  out cols 16:32 = 0
    w5 = w_ref[_W5_R:_W5_R + 32, :]                    # (32, 32)  rows 16:32, cols 4:32 = 0
    b1 = b_ref[0:1, :]
    b2 = b_ref[1:2, :]
    b3 = b_ref[2:3, :]
    b4 = b_ref[3:4, :]
    b5 = b_ref[4:5, :]

    # ---- context encoder: Linear(16,32) -> ReLU -> (Dropout=id) -> Linear(32,16) -> ReLU
    # TODO(synk): Dropout(0.1) is identity at inference; no RNG mask applied.
    h1 = jnp.maximum(jnp.dot(ctx, w1, preferred_element_type=f32) + b1, 0.0)
    enc = jnp.maximum(
        jnp.dot(h1.astype(bf16), w2, preferred_element_type=f32) + b2, 0.0)

    # ---- adapter layer 1: concat([enc, beh, anom]) @ W3 + b3 as split partial
    # matmuls (mathematically identical); K=1 anomaly term is a VPU broadcast FMA.
    a = (jnp.dot(enc.astype(bf16), w3e, preferred_element_type=f32)
         + jnp.dot(beh, w3b, preferred_element_type=f32)
         + anom * w3a
         + b3)
    a = jnp.maximum(a, 0.0)

    # ---- Linear(32,16) -> ReLU
    a2 = jnp.maximum(
        jnp.dot(a.astype(bf16), w4, preferred_element_type=f32) + b4, 0.0)

    # ---- Linear(16,4) -> Softmax(dim=1). Columns 4:32 of (a2 @ w5 + b5) are
    # exactly zero by construction; slice them off (lane-0-aligned) so the
    # softmax normalizes over the 4 real classes only.
    logits = (jnp.dot(a2.astype(bf16), w5, preferred_element_type=f32)
              + b5)[:, :NUM_CLASSES]
    m = jnp.max(logits, axis=1, keepdims=True)
    e = jnp.exp(logits - m)
    out_ref[...] = e / jnp.sum(e, axis=1, keepdims=True)   # exact row-sums == 1


@functools.partial(jax.jit, static_argnames=("tile_batch",))
def context_adapter_forward(context_features, behavioral_embedding, anomaly_score,
                            wslab, bslab, *, tile_batch=TB_DEFAULT):
    batch = context_features.shape[0]

    # Tile sizing: multiple of 16 (bf16 sublane pack), default 2048; keep >=2
    # grid steps when the batch allows it (so both v7x TensorCores get work
    # under dimension_semantics=("parallel",)).  No jnp.pad / full-tile padding:
    # grid = cdiv(batch, tb) and Pallas masks the partial edge block.
    tb = _round_up(max(int(tile_batch), 16), 16)
    tb = max(16, min(tb, _round_up((batch + 1) // 2, 16)))
    grid = (pl.cdiv(batch, tb),)

    return pl.pallas_call(
        _context_adapter_kernel,
        out_shape=jax.ShapeDtypeStruct((batch, NUM_CLASSES), jnp.float32),
        grid=grid,
        in_specs=[
            pl.BlockSpec((tb, CONTEXT_FEATURES), lambda i: (i, 0)),
            pl.BlockSpec((tb, BEHAVIORAL_VECTOR_DIM), lambda i: (i, 0)),
            pl.BlockSpec((tb, 1), lambda i: (i, 0)),
            # Parameter slabs: full-extent blocks + constant index_map -> DMA'd
            # once and VMEM-resident across every batch tile.
            pl.BlockSpec((_WSLAB_ROWS, PAD_W), lambda i: (0, 0)),
            pl.BlockSpec((_BSLAB_ROWS, PAD_W), lambda i: (0, 0)),
        ],
        out_specs=pl.BlockSpec((tb, NUM_CLASSES), lambda i: (i, 0)),
        compiler_params=pltpu.CompilerParams(
            dimension_semantics=("parallel",),      # megacore sharding on v7x
            vmem_limit_bytes=48 * 1024 * 1024,      # above v5e's 16 MiB scoped default
        ),
    )(context_features, behavioral_embedding, anomaly_score, wslab, bslab)


# ----------------------------------------------------------------------------
# Parameter construction / packing
# ----------------------------------------------------------------------------
def init_params(key):
    """Deterministic synthetic params (PyTorch Linear shapes, stored [in, out])."""
    def linear(k, fan_in, fan_out):
        kw, kb = jax.random.split(k)
        bound = 1.0 / jnp.sqrt(fan_in)
        w = jax.random.uniform(kw, (fan_in, fan_out), jnp.float32, -bound, bound)
        b = jax.random.uniform(kb, (fan_out,), jnp.float32, -bound, bound)
        return w, b

    keys = jax.random.split(key, 5)
    w1, b1 = linear(keys[0], CONTEXT_FEATURES, 32)
    w2, b2 = linear(keys[1], 32, 16)
    w3, b3 = linear(keys[2], ADAPTER_IN, 32)
    w4, b4 = linear(keys[3], 32, 16)
    w5, b5 = linear(keys[4], 16, 4)
    return dict(w1=w1, b1=b1, w2=w2, b2=b2, w3=w3, b3=b3, w4=w4, b4=b4, w5=w5, b5=b5)


def _pad_to(w, rows):
    k, n = w.shape
    return jnp.zeros((rows, PAD_W), jnp.float32).at[:k, :n].set(w)


def _pad_b(b):
    return jnp.zeros((1, PAD_W), jnp.float32).at[0, :b.shape[-1]].set(b)


def pack_params(p):
    """Pack all weights into one bf16 slab and all biases into one f32 slab.

    W3 is split along its input axis to mirror the concat order
    [context_encoded (16) | behavioral_embedding (32) | anomaly_score (1)];
    zero-padding rows/cols keeps the padded-width-32 pipeline mathematically
    identical to the original network.
    """
    w3e = p["w3"][:CONTEXT_FEATURES]
    w3b = p["w3"][CONTEXT_FEATURES:CONTEXT_FEATURES + BEHAVIORAL_VECTOR_DIM]
    w3a = p["w3"][CONTEXT_FEATURES + BEHAVIORAL_VECTOR_DIM:]

    wslab = jnp.concatenate([
        _pad_to(p["w1"], 16),    # rows   0: 16  ctx(16)      -> h1(32)
        _pad_to(p["w2"], 32),    # rows  16: 48  h1(32)       -> enc(16, pad 32)
        _pad_to(w3e, 32),        # rows  48: 80  enc(pad 32)  -> a(32)
        _pad_to(w3b, 32),        # rows  80:112  beh(32)      -> a(32)
        _pad_to(w3a, 16),        # rows 112:128  anomaly row (only row 112 real)
        _pad_to(p["w4"], 32),    # rows 128:160  a(32)        -> a2(16, pad 32)
        _pad_to(p["w5"], 32),    # rows 160:192  a2(pad 32)   -> logits(4, pad 32)
    ], axis=0).astype(jnp.bfloat16)                       # (192, 32) ~12 KB

    bslab = jnp.concatenate(
        [_pad_b(p["b1"]), _pad_b(p["b2"]), _pad_b(p["b3"]), _pad_b(p["b4"]),
         _pad_b(p["b5"]), jnp.zeros((3, PAD_W), jnp.float32)], axis=0)  # (8, 32)
    return wslab, bslab


# ----------------------------------------------------------------------------
# References
# ----------------------------------------------------------------------------
def reference_forward_f32(ctx, beh, anom, p):
    """Exact f32 forward of the PyTorch ContextAdapter (inference: Dropout=id)."""
    h = jax.nn.relu(ctx @ p["w1"] + p["b1"])
    enc = jax.nn.relu(h @ p["w2"] + p["b2"])
    comb = jnp.concatenate([enc, beh, anom], axis=1)
    a = jax.nn.relu(comb @ p["w3"] + p["b3"])
    a2 = jax.nn.relu(a @ p["w4"] + p["b4"])
    return jax.nn.softmax(a2 @ p["w5"] + p["b5"], axis=1)


def reference_forward_quant(ctx, beh, anom, p):
    """Pure-JAX reference mirroring the kernel's bf16 matmul-operand casts."""
    f32, bf16 = jnp.float32, jnp.bfloat16
    q = lambda x: x.astype(bf16)
    h = jax.nn.relu(jnp.dot(q(ctx), q(p["w1"]), preferred_element_type=f32) + p["b1"])
    enc = jax.nn.relu(jnp.dot(q(h), q(p["w2"]), preferred_element_type=f32) + p["b2"])
    w3e = p["w3"][:CONTEXT_FEATURES]
    w3b = p["w3"][CONTEXT_FEATURES:CONTEXT_FEATURES + BEHAVIORAL_VECTOR_DIM]
    w3a = p["w3"][CONTEXT_FEATURES + BEHAVIORAL_VECTOR_DIM:]
    a = jax.nn.relu(jnp.dot(q(enc), q(w3e), preferred_element_type=f32)
                    + jnp.dot(q(beh), q(w3b), preferred_element_type=f32)
                    + anom * q(w3a).astype(f32)
                    + p["b3"])
    a2 = jax.nn.relu(jnp.dot(q(a), q(p["w4"]), preferred_element_type=f32) + p["b4"])
    logits = jnp.dot(q(a2), q(p["w5"]), preferred_element_type=f32) + p["b5"]
    return jax.nn.softmax(logits, axis=1)


if __name__ == "__main__":
    key = jax.random.PRNGKey(0)
    k_ctx, k_beh, k_anom, k_params = jax.random.split(key, 4)
    params = init_params(k_params)
    wslab, bslab = pack_params(params)

    # ---- exact single-tile case (batch is a multiple of 16)
    batch = 16
    ctx = jax.random.normal(k_ctx, (batch, CONTEXT_FEATURES), jnp.float32)
    beh = jax.random.normal(k_beh, (batch, BEHAVIORAL_VECTOR_DIM), jnp.float32)
    anom = jax.random.uniform(k_anom, (batch, 1), jnp.float32)

    out = jax.block_until_ready(context_adapter_forward(ctx, beh, anom, wslab, bslab))
    assert out.shape == (batch, NUM_CLASSES)
    assert jnp.allclose(out, reference_forward_quant(ctx, beh, anom, params),
                        atol=5e-3, rtol=5e-3)
    assert jnp.allclose(out, reference_forward_f32(ctx, beh, anom, params), atol=5e-2)
    assert jnp.allclose(jnp.sum(out, axis=1), 1.0, atol=1e-5)

    # ---- multi-tile grid with a masked partial edge tile (no padding pre-pass)
    batch2 = 20
    ctx2 = jax.random.normal(k_ctx, (batch2, CONTEXT_FEATURES), jnp.float32)
    beh2 = jax.random.normal(k_beh, (batch2, BEHAVIORAL_VECTOR_DIM), jnp.float32)
    anom2 = jax.random.uniform(k_anom, (batch2, 1), jnp.float32)

    out2 = jax.block_until_ready(
        context_adapter_forward(ctx2, beh2, anom2, wslab, bslab, tile_batch=16))
    assert out2.shape == (batch2, NUM_CLASSES)
    assert jnp.allclose(out2, reference_forward_quant(ctx2, beh2, anom2, params),
                        atol=5e-3, rtol=5e-3)
    assert jnp.allclose(jnp.sum(out2, axis=1), 1.0, atol=1e-5)

    print("KERNEL_OK")
</pallas_src>

<mosaic_0001>
module attributes {stable_mosaic.version = 11 : i64} {
  func.func @_context_adapter_kernel(%arg0: i32, %arg1: memref<16x16xf32, #tpu.memory_space<vmem>>, %arg2: memref<16x32xf32, #tpu.memory_space<vmem>>, %arg3: memref<16x1xf32, #tpu.memory_space<vmem>>, %arg4: memref<192x32xbf16, #tpu.memory_space<vmem>>, %arg5: memref<8x32xf32, #tpu.memory_space<vmem>>, %arg6: memref<16x4xf32, #tpu.memory_space<vmem>>) attributes {dimension_semantics = [#tpu.dimension_semantics<parallel>], iteration_bounds = array<i64: 1>, scalar_prefetch = 0 : i64, scratch_operands = 0 : i64, tpu.core_type = #tpu.core_type<tc>, window_params = [{transform_indices = @transform_0, window_bounds = array<i64: 16, 16>}, {transform_indices = @transform_1, window_bounds = array<i64: 16, 32>}, {transform_indices = @transform_2, window_bounds = array<i64: 16, 1>}, {pipeline_mode = #tpu.pipeline_mode<synchronous>, transform_indices = @transform_3, window_bounds = array<i64: 192, 32>}, {pipeline_mode = #tpu.pipeline_mode<synchronous>, transform_indices = @transform_4, window_bounds = array<i64: 8, 32>}, {transform_indices = @transform_5, window_bounds = array<i64: 16, 4>}]} {
    %c0 = arith.constant 0 : index
    %c0_0 = arith.constant 0 : index
    %0 = vector.load %arg1[%c0, %c0_0] : memref<16x16xf32, #tpu.memory_space<vmem>>, vector<16x16xf32>
    %1 = arith.truncf %0 : vector<16x16xf32> to vector<16x16xbf16>
    %c0_1 = arith.constant 0 : index
    %c0_2 = arith.constant 0 : index
    %2 = vector.load %arg2[%c0_1, %c0_2] : memref<16x32xf32, #tpu.memory_space<vmem>>, vector<16x32xf32>
    %3 = arith.truncf %2 : vector<16x32xf32> to vector<16x32xbf16>
    %c0_3 = arith.constant 0 : index
    %c0_4 = arith.constant 0 : index
    %4 = vector.load %arg3[%c0_3, %c0_4] : memref<16x1xf32, #tpu.memory_space<vmem>>, vector<16x1xf32>
    %c0_5 = arith.constant 0 : index
    %c0_6 = arith.constant 0 : index
    %5 = vector.load %arg4[%c0_5, %c0_6] : memref<192x32xbf16, #tpu.memory_space<vmem>>, vector<16x32xbf16>
    %c16 = arith.constant 16 : index
    %c0_7 = arith.constant 0 : index
    %6 = vector.load %arg4[%c16, %c0_7] : memref<192x32xbf16, #tpu.memory_space<vmem>>, vector<32x32xbf16>
    %c48 = arith.constant 48 : index
    %c0_8 = arith.constant 0 : index
    %7 = vector.load %arg4[%c48, %c0_8] : memref<192x32xbf16, #tpu.memory_space<vmem>>, vector<32x32xbf16>
    %c80 = arith.constant 80 : index
    %c0_9 = arith.constant 0 : index
    %8 = vector.load %arg4[%c80, %c0_9] : memref<192x32xbf16, #tpu.memory_space<vmem>>, vector<32x32xbf16>
    %c112 = arith.constant 112 : index
    %c0_10 = arith.constant 0 : index
    %9 = vector.load %arg4[%c112, %c0_10] : memref<192x32xbf16, #tpu.memory_space<vmem>>, vector<1x32xbf16>
    %10 = arith.extf %9 : vector<1x32xbf16> to vector<1x32xf32>
    %c128 = arith.constant 128 : index
    %c0_11 = arith.constant 0 : index
    %11 = vector.load %arg4[%c128, %c0_11] : memref<192x32xbf16, #tpu.memory_space<vmem>>, vector<32x32xbf16>
    %c160 = arith.constant 160 : index
    %c0_12 = arith.constant 0 : index
    %12 = vector.load %arg4[%c160, %c0_12] : memref<192x32xbf16, #tpu.memory_space<vmem>>, vector<32x32xbf16>
    %c0_13 = arith.constant 0 : index
    %c0_14 = arith.constant 0 : index
    %13 = vector.load %arg5[%c0_13, %c0_14] : memref<8x32xf32, #tpu.memory_space<vmem>>, vector<1x32xf32>
    %c1 = arith.constant 1 : index
    %c0_15 = arith.constant 0 : index
    %14 = vector.load %arg5[%c1, %c0_15] : memref<8x32xf32, #tpu.memory_space<vmem>>, vector<1x32xf32>
    %c2 = arith.constant 2 : index
    %c0_16 = arith.constant 0 : index
    %15 = vector.load %arg5[%c2, %c0_16] : memref<8x32xf32, #tpu.memory_space<vmem>>, vector<1x32xf32>
    %c3 = arith.constant 3 : index
    %c0_17 = arith.constant 0 : index
    %16 = vector.load %arg5[%c3, %c0_17] : memref<8x32xf32, #tpu.memory_space<vmem>>, vector<1x32xf32>
    %c4 = arith.constant 4 : index
    %c0_18 = arith.constant 0 : index
    %17 = vector.load %arg5[%c4, %c0_18] : memref<8x32xf32, #tpu.memory_space<vmem>>, vector<1x32xf32>
    %cst = arith.constant dense<0.000000e+00> : vector<16x32xf32>
    %18 = tpu.matmul %1, %5, %cst {dimension_numbers = #tpu.dot_dimension_numbers<[1], [0], [0], [1], [0, 0, 1, 1], [], []>} : vector<16x16xbf16>, vector<16x32xbf16>, vector<16x32xf32> -> vector<16x32xf32>
    %19 = vector.broadcast %13 : vector<1x32xf32> to vector<16x32xf32>
    %20 = arith.addf %18, %19 : vector<16x32xf32>
    %cst_19 = arith.constant 0.000000e+00 : f32
    %21 = vector.broadcast %cst_19 : f32 to vector<16x32xf32>
    %22 = arith.maximumf %20, %21 : vector<16x32xf32>
    %23 = arith.truncf %22 : vector<16x32xf32> to vector<16x32xbf16>
    %cst_20 = arith.constant dense<0.000000e+00> : vector<16x32xf32>
    %24 = tpu.matmul %23, %6, %cst_20 {dimension_numbers = #tpu.dot_dimension_numbers<[1], [0], [0], [1], [0, 0, 1, 1], [], []>} : vector<16x32xbf16>, vector<32x32xbf16>, vector<16x32xf32> -> vector<16x32xf32>
    %25 = vector.broadcast %14 : vector<1x32xf32> to vector<16x32xf32>
    %26 = arith.addf %24, %25 : vector<16x32xf32>
    %cst_21 = arith.constant 0.000000e+00 : f32
    %27 = vector.broadcast %cst_21 : f32 to vector<16x32xf32>
    %28 = arith.maximumf %26, %27 : vector<16x32xf32>
    %29 = arith.truncf %28 : vector<16x32xf32> to vector<16x32xbf16>
    %cst_22 = arith.constant dense<0.000000e+00> : vector<16x32xf32>
    %30 = tpu.matmul %29, %7, %cst_22 {dimension_numbers = #tpu.dot_dimension_numbers<[1], [0], [0], [1], [0, 0, 1, 1], [], []>} : vector<16x32xbf16>, vector<32x32xbf16>, vector<16x32xf32> -> vector<16x32xf32>
    %cst_23 = arith.constant dense<0.000000e+00> : vector<16x32xf32>
    %31 = tpu.matmul %3, %8, %cst_23 {dimension_numbers = #tpu.dot_dimension_numbers<[1], [0], [0], [1], [0, 0, 1, 1], [], []>} : vector<16x32xbf16>, vector<32x32xbf16>, vector<16x32xf32> -> vector<16x32xf32>
    %32 = arith.addf %30, %31 : vector<16x32xf32>
    %33 = vector.broadcast %4 : vector<16x1xf32> to vector<16x32xf32>
    %34 = vector.broadcast %10 : vector<1x32xf32> to vector<16x32xf32>
    %35 = arith.mulf %33, %34 : vector<16x32xf32>
    %36 = arith.addf %32, %35 : vector<16x32xf32>
    %37 = vector.broadcast %15 : vector<1x32xf32> to vector<16x32xf32>
    %38 = arith.addf %36, %37 : vector<16x32xf32>
    %cst_24 = arith.constant 0.000000e+00 : f32
    %39 = vector.broadcast %cst_24 : f32 to vector<16x32xf32>
    %40 = arith.maximumf %38, %39 : vector<16x32xf32>
    %41 = arith.truncf %40 : vector<16x32xf32> to vector<16x32xbf16>
    %cst_25 = arith.constant dense<0.000000e+00> : vector<16x32xf32>
    %42 = tpu.matmul %41, %11, %cst_25 {dimension_numbers = #tpu.dot_dimension_numbers<[1], [0], [0], [1], [0, 0, 1, 1], [], []>} : vector<16x32xbf16>, vector<32x32xbf16>, vector<16x32xf32> -> vector<16x32xf32>
    %43 = vector.broadcast %16 : vector<1x32xf32> to vector<16x32xf32>
    %44 = arith.addf %42, %43 : vector<16x32xf32>
    %cst_26 = arith.constant 0.000000e+00 : f32
    %45 = vector.broadcast %cst_26 : f32 to vector<16x32xf32>
    %46 = arith.maximumf %44, %45 : vector<16x32xf32>
    %47 = arith.truncf %46 : vector<16x32xf32> to vector<16x32xbf16>
    %cst_27 = arith.constant dense<0.000000e+00> : vector<16x32xf32>
    %48 = tpu.matmul %47, %12, %cst_27 {dimension_numbers = #tpu.dot_dimension_numbers<[1], [0], [0], [1], [0, 0, 1, 1], [], []>} : vector<16x32xbf16>, vector<32x32xbf16>, vector<16x32xf32> -> vector<16x32xf32>
    %49 = vector.broadcast %17 : vector<1x32xf32> to vector<16x32xf32>
    %50 = arith.addf %48, %49 : vector<16x32xf32>
    %51 = vector.extract_strided_slice %50 {offsets = [0, 0], sizes = [16, 4], strides = [1, 1]} : vector<16x32xf32> to vector<16x4xf32>
    %cst_28 = arith.constant dense<0xFF800000> : vector<16xf32>
    %52 = vector.multi_reduction <maximumf>, %51, %cst_28 [1] : vector<16x4xf32> to vector<16xf32>
    %53 = vector.shape_cast %52 : vector<16xf32> to vector<16x1xf32>
    %54 = vector.broadcast %53 : vector<16x1xf32> to vector<16x4xf32>
    %55 = arith.subf %51, %54 : vector<16x4xf32>
    %56 = math.exp %55 : vector<16x4xf32>
    %cst_29 = arith.constant dense<0.000000e+00> : vector<16xf32>
    %57 = vector.multi_reduction <add>, %56, %cst_29 [1] : vector<16x4xf32> to vector<16xf32>
    %58 = vector.shape_cast %57 : vector<16xf32> to vector<16x1xf32>
    %59 = vector.broadcast %58 : vector<16x1xf32> to vector<16x4xf32>
    %60 = arith.divf %56, %59 : vector<16x4xf32>
    %c0_30 = arith.constant 0 : index
    %c0_31 = arith.constant 0 : index
    %61 = vector.load %arg6[%c0_30, %c0_31] : memref<16x4xf32, #tpu.memory_space<vmem>>, vector<16x4xf32>
    tpu.vector_store %arg6[%c0_30, %c0_31], %60 {strides = array<i32>} : memref<16x4xf32, #tpu.memory_space<vmem>>, vector<16x4xf32>,
    return
  }
  func.func @transform_0(%arg0: i32) -> (i32, i32) {
    %c0_i32 = arith.constant 0 : i32
    %c0_i32_0 = arith.constant 0 : i32
    return %arg0, %c0_i32 : i32, i32
  }
  func.func @transform_1(%arg0: i32) -> (i32, i32) {
    %c0_i32 = arith.constant 0 : i32
    %c0_i32_0 = arith.constant 0 : i32
    return %arg0, %c0_i32 : i32, i32
  }
  func.func @transform_2(%arg0: i32) -> (i32, i32) {
    %c0_i32 = arith.constant 0 : i32
    %c0_i32_0 = arith.constant 0 : i32
    return %arg0, %c0_i32 : i32, i32
  }
  func.func @transform_3(%arg0: i32) -> (i32, i32) {
    %c0_i32 = arith.constant 0 : i32
    %c0_i32_0 = arith.constant 0 : i32
    %c0_i32_1 = arith.constant 0 : i32
    return %c0_i32, %c0_i32_0 : i32, i32
  }
  func.func @transform_4(%arg0: i32) -> (i32, i32) {
    %c0_i32 = arith.constant 0 : i32
    %c0_i32_0 = arith.constant 0 : i32
    %c0_i32_1 = arith.constant 0 : i32
    return %c0_i32, %c0_i32_0 : i32, i32
  }
  func.func @transform_5(%arg0: i32) -> (i32, i32) {
    %c0_i32 = arith.constant 0 : i32
    %c0_i32_0 = arith.constant 0 : i32
    return %arg0, %c0_i32 : i32, i32
  }
}

</mosaic_0001>

<bundles_post_ra>
// kernel: context_adapter_forward.1
= control target key start
LH: loop header
LB: loop body
LE: loop exit
PB: predicated region body
PF: predicated region fallthrough
CT: control target
= control target key end

     0   :  { %vm65_vm0 = vcmask 130048   ;;  %vm99_vm1 = vcmask 261120   ;;  %v393_v22 = vmov 0   ;;  %vm262_vm2 = vcmask 31744   ;;  %s510_s3 = inlined_call_operand.vmem [shape: bf16[192,32], index: 3, kind: input, shape index: {}]   ;;  %s511_s0 = inlined_call_operand.vmem [shape: f32[16,16], index: 0, kind: input, shape index: {}]   ;;  %s512_s4 = inlined_call_operand.vmem [shape: f32[8,32], index: 4, kind: input, shape index: {}]   ;;  %s513_s1 = inlined_call_operand.vmem [shape: f32[16,32], index: 1, kind: input, shape index: {}]   ;;  %s514_s2 = inlined_call_operand.vmem [shape: f32[16,1], index: 2, kind: input, shape index: {}]   ;;  %s515_s5 = inlined_call_operand.vmem [shape: f32[16,4], index: 5, kind: output, shape index: {}]  }
   0x1   :  { %v367_v0 = vld [vmem:[%s510_s3] sm:$0xff]  ;;  %v22_v2 = vld [vmem:[%s511_s0 + $0x8] sm:$0xff]  ;;  %v369_v4 = vld [vmem:[%s510_s3 + $0x10] sm:$0xff]  ;;  %379 = vset.pattern.permute.xlu0 %v393_v22 }
   0x2   :  { %v21_v1 = vld [vmem:[%s511_s0] sm:$0xff]  ;;  %76 = vmatpush.bf16.msra.mxu0 %v367_v0  ;;  %109 = vmatpush.bf16.msra.mxu1 %v369_v4  ;;  %v368_v5 = vld [vmem:[%s510_s3 + $0x8] sm:$0xff]  ;;  %v373_v14 = vld [vmem:[%s510_s3 + $0x30] sm:$0xff] }
   0x3   :  { %v23_v3 = vpack.c.bf16 %v22_v2, %v21_v1  ;;  %v380_v7 = vld [vmem:[%s512_s4] ss:$0 sm:$0xff]  ;;  %141 = vmatpush.bf16.msra.mxu2 %v373_v14  ;;  %v372_v15 = vld [vmem:[%s510_s3 + $0x28] sm:$0xff]  ;;  %v370_v20 = vld [vmem:[%s510_s3 + $0x18] sm:$0xff] }
   0x4   :  { %v24_v16 = vld [vmem:[%s513_s1] sm:$0xff]  ;;  %v25_v17 = vld [vmem:[%s513_s1 + $0x8] sm:$0xff]  ;;  %v377_v34 = vld [vmem:[%s510_s3 + $0x58] sm:$0xff] }
   0x5   :  { %321 = vmatmul.msk.bf16.vlgmr.msra.gmra.mxu0 %vm65_vm0, %v23_v3  ;;  %v26_v18 = vpack.c.bf16 %v25_v17, %v24_v16  ;;  %v371_v19 = vld [vmem:[%s510_s3 + $0x20] sm:$0xff]  ;;  %v28_v23 = vld [vmem:[%s514_s2 + $0x8] sm:$0xff]  ;;  %v43_v35 = vld [vmem:[%s510_s3 + $0x38] sm:$0x1] }
   0x6   :  { %110 = vmatpush.bf16.msra.mxu1 %v368_v5  ;;  %170 = vmatpush.bf16.msra.mxu3 %v371_v19  ;;  %v27_v21 = vld [vmem:[%s514_s2] sm:$0xff]  ;;  %v375_v32 = vld [vmem:[%s510_s3 + $0x48] sm:$0xff]  ;;  %v44_v36 = vunpack.c.l.bf16 %v43_v35  ;;  %v376_v56 = vld [vmem:[%s510_s3 + $0x50] sm:$0xff] }
   0x7   :  { %142 = vmatpush.bf16.msra.mxu2 %v372_v15  ;;  %180 = vperm.xlu0 %379, %v27_v21   ;;  %v381_v25 = vld [vmem:[%s512_s4 + $0x1] ss:$0 sm:$0xff]  ;;  %v382_v45 = vld [vmem:[%s512_s4 + $0x2] ss:$0 sm:$0xff]  ;;  %v383_v58 = vld [vmem:[%s512_s4 + $0x3] ss:$0 sm:$0xff] }
   0x8   :  { %221 = vmatpush.bf16.msrb.mxu0 %v375_v32  ;;  %v374_v33 = vld [vmem:[%s510_s3 + $0x40] sm:$0xff]  ;;  %v188_v39 = vperm.slane %v44_v36, 0 }
   0x9   :  { %v384_v1 = vld [vmem:[%s512_s4 + $0x4] ss:$0 sm:$0xff] }
   0xa   :  { %339 = vmatmul.msk.bf16.vlgmr.msra.gmra.mxu2 %vm99_vm1, %v26_v18  ;;  %171 = vmatpush.bf16.msra.mxu3 %v370_v20 }
   0xb   :  { %254 = vmatpush.bf16.msrb.mxu1 %v377_v34 }
   0xc   :  { %222 = vmatpush.bf16.msrb.mxu0 %v374_v33 }
   0xf   :  { %185 = vperm.xlu0 %379, %v28_v23   ;;  %255 = vmatpush.bf16.msrb.mxu1 %v376_v56 }
  0x79   :  { %v181_v37 = vpop.permute.xlu0 %180 }
  0x7a   :  { %v189_v41 = vmul.f32 %v188_v39, %v181_v37 }
  0x81   :  { %v186_v43 = vpop.permute.xlu0 %185 }
  0x82   :  { %v78_v6 = vpop.f32.mrf.mxu0  ;;  %v190_v48 = vmul.f32 %v188_v39, %v186_v43 }
  0x83   :  { %v79_v8 = vadd.f32 %v380_v7, %v78_v6 }
  0x85   :  { %v83_v11 = vmax.f32 %v79_v8, 0.0 }
  0x8a   :  { %v80_v9 = vpop.f32.mrf.mxu0 }
  0x8b   :  { %v81_v10 = vadd.f32 %v380_v7, %v80_v9 }
  0x8d   :  { %v84_v12 = vmax.f32 %v81_v10, 0.0  ;;  %v144_v38 = vpop.f32.mrf.mxu2 }
  0x8f   :  { %v85_v13 = vpack.c.bf16 %v84_v12, %v83_v11 }
  0x91   :  { %330 = vmatmul.msk.bf16.vlgmr.msra.gmra.mxu1 %vm99_vm1, %v85_v13 }
  0x95   :  { %v146_v46 = vpop.f32.mrf.mxu2 }
 0x10e   :  { %v112_v24 = vpop.f32.mrf.mxu1 }
 0x10f   :  { %v113_v26 = vadd.f32 %v381_v25, %v112_v24 }
 0x111   :  { %v117_v29 = vmax.f32 %v113_v26, 0.0 }
 0x116   :  { %v114_v27 = vpop.f32.mrf.mxu1 }
 0x117   :  { %v115_v28 = vadd.f32 %v381_v25, %v114_v27 }
 0x119   :  { %v118_v30 = vmax.f32 %v115_v28, 0.0 }
 0x11b   :  { %v119_v31 = vpack.c.bf16 %v118_v30, %v117_v29 }
 0x11d   :  { %348 = vmatmul.msk.bf16.vlgmr.msra.gmra.mxu3 %vm99_vm1, %v119_v31 }
 0x1a0   :  { %v173_v40 = vpop.f32.mrf.mxu3 }
 0x1a1   :  { %v174_v42 = vadd.f32 %v173_v40, %v144_v38 }
 0x1a3   :  { %v191_v44 = vadd.f32 %v189_v41, %v174_v42 }
 0x1a5   :  { %v194_v50 = vadd.f32 %v382_v45, %v191_v44 }
 0x1a7   :  { %v196_v53 = vmax.f32 %v194_v50, 0.0 }
 0x1a8   :  { %v175_v47 = vpop.f32.mrf.mxu3 }
 0x1a9   :  { %v176_v49 = vadd.f32 %v175_v47, %v146_v46 }
 0x1ab   :  { %v192_v51 = vadd.f32 %v190_v48, %v176_v49 }
 0x1ad   :  { %v195_v52 = vadd.f32 %v382_v45, %v192_v51 }
 0x1af   :  { %v197_v54 = vmax.f32 %v195_v52, 0.0 }
 0x1b1   :  { %v198_v55 = vpack.c.bf16 %v197_v54, %v196_v53 }
 0x1b3   :  { %357 = vmatmul.msk.bf16.vlgmr.msrb.gmra.mxu0 %vm99_vm1, %v198_v55 }
 0x230   :  { %v224_v57 = vpop.f32.mrf.mxu0 }
 0x231   :  { %v225_v59 = vadd.f32 %v383_v58, %v224_v57 }
 0x233   :  { %v229_v62 = vmax.f32 %v225_v59, 0.0 }
 0x238   :  { %v226_v60 = vpop.f32.mrf.mxu0 }
 0x239   :  { %v227_v61 = vadd.f32 %v383_v58, %v226_v60 }
 0x23b   :  { %v230_v63 = vmax.f32 %v227_v61, 0.0 }
 0x23d   :  { %v231_v0 = vpack.c.bf16 %v230_v63, %v229_v62 }
 0x23f   :  { %366 = vmatmul.msk.bf16.vlgmr.msrb.gmra.mxu1 %vm99_vm1, %v231_v0 }
 0x2bc   :  { %v257_v2 = vpop.f32.mrf.mxu1 }
 0x2bd   :  { %v258_v3 = vadd.f32 %v384_v1, %v257_v2 }
 0x2bf   :  { %v263_v4 = vsel %vm262_vm2, %v258_v3, -inf }
 0x2c0   :  { %264 = vmax.xlane.f32.xlu1 %v263_v4 }
 0x2c4   :  { %v259_v5 = vpop.f32.mrf.mxu1 }
 0x2c5   :  { %v260_v6 = vadd.f32 %v384_v1, %v259_v5 }
 0x2c7   :  { %v266_v7 = vsel %vm262_vm2, %v260_v6, -inf }
 0x2c8   :  { %267 = vmax.xlane.f32.xlu1 %v266_v7 }
 0x333   :  { %v265_v8 = vpop.xlane.xlu1 %264 }
 0x334   :  { %v269_v9 = vsub.f32 %v258_v3, %v265_v8 }
 0x336   :  { %v271_v10 = vmul.f32 1.442695, %v269_v9 }
 0x338   :  { %385 = vpow2.f32 %v271_v10 }
 0x33b   :  { %v268_v11 = vpop.xlane.xlu1 %267 }
 0x33c   :  { %v270_v12 = vsub.f32 %v260_v6, %v268_v11 }
 0x33e   :  { %v386_v13 = vpop.eup %385  ;;  %v273_v14 = vmul.f32 1.442695, %v270_v12 }
 0x33f   :  { %v275_v15 = vsel %vm262_vm2, %v386_v13, 0.0 }
 0x340   :  { %387 = vpow2.f32 %v273_v14  ;;  %276 = vadd.xlane.f32.xlu2 %v275_v15 }
 0x346   :  { %v388_v16 = vpop.eup %387 }
 0x347   :  { %v278_v17 = vsel %vm262_vm2, %v388_v16, 0.0 }
 0x348   :  { %279 = vadd.xlane.f32.xlu2 %v278_v17 }
 0x3b3   :  { %v277_v18 = vpop.xlane.xlu2 %276 }
 0x3b4   :  { %389 = vrcp.f32 %v277_v18  ;;  %v292_v23 = vand.u32 2147483648, %v277_v18  ;;  %v290_v25 = vand.u32 2147483647, %v277_v18  ;;  %vm286_vm4 = vweird.f32 %v277_v18 }
 0x3b6   :  { %v293_v28 = vor.u32 1.1754944e-38, %v292_v23  ;;  %vm291_vm6 = vcmp.eq.f32.partialorder %v290_v25, 8.507059e+37 }
 0x3ba   :  { %v390_v19 = vpop.eup %389 }
 0x3bb   :  { %v282_v20 = vmul.f32 %v390_v19, %v277_v18  ;;  %v280_v21 = vpop.xlane.xlu2 %279  ;;  %vm287_vm3 = vweird.f32 %v390_v19 }
 0x3bc   :  { %391 = vrcp.f32 %v280_v21  ;;  %vm288_vm5 = vmor %vm286_vm4, %vm287_vm3  ;;  %v307_v34 = vand.u32 2147483648, %v280_v21  ;;  %v305_v36 = vand.u32 2147483647, %v280_v21  ;;  %vm301_vm8 = vweird.f32 %v280_v21 }
 0x3bd   :  { %v283_v22 = vsub.f32 1.0, %v282_v20 }
 0x3be   :  { %v308_v38 = vor.u32 1.1754944e-38, %v307_v34  ;;  %vm306_vm10 = vcmp.eq.f32.partialorder %v305_v36, 8.507059e+37 }
 0x3bf   :  { %v284_v24 = vmul.f32 %v390_v19, %v283_v22 }
 0x3c1   :  { %v285_v26 = vadd.f32 %v390_v19, %v284_v24 }
 0x3c2   :  { %v392_v27 = vpop.eup %391 }
 0x3c3   :  { %v289_v29 = vsel %vm288_vm5, %v390_v19, %v285_v26  ;;  %v297_v30 = vmul.f32 %v392_v27, %v280_v21  ;;  %vm302_vm7 = vweird.f32 %v392_v27 }
 0x3c4   :  { %v294_v31 = vsel %vm291_vm6, %v293_v28, %v289_v29  ;;  %vm303_vm9 = vmor %vm301_vm8, %vm302_vm7 }
 0x3c5   :  { %v295_v32 = vmul.f32 %v386_v13, %v294_v31  ;;  %v298_v33 = vsub.f32 1.0, %v297_v30 }
 0x3c7   :  { %311 = vst.msk [vmem:[%s515_s5] sm:$0xff] %vm262_vm2, %v295_v32  ;;  %v299_v35 = vmul.f32 %v392_v27, %v298_v33 }
 0x3c9   :  { %v300_v37 = vadd.f32 %v392_v27, %v299_v35 }
 0x3cb   :  { %v304_v39 = vsel %vm303_vm9, %v392_v27, %v300_v37 }
 0x3cc   :  { %v309_v40 = vsel %vm306_vm10, %v308_v38, %v304_v39 }
 0x3cd   :  { %v310_v41 = vmul.f32 %v388_v16, %v309_v40 }
 0x3cf   :  { %312 = vst.msk [vmem:[%s515_s5 + $0x8] sm:$0xff] %vm262_vm2, %v310_v41 }

</bundles_post_ra>
